<compile_context>
chip_gen: v7x
topology: tpu7x:2x2x1
jax: 0.10.0
libtpu: 0.0.40
codegen_flags: <defaults>
</compile_context>

<pallas_src>
import jax
import jax.numpy as jnp
from jax.experimental import pallas as pl
from jax.experimental.pallas import tpu as pltpu


# ----------------------------------------------------------------------------
# Pallas kernel: fused Linear + bias + ReLU (the hot path of the classifier)
# ----------------------------------------------------------------------------
def _fc_relu_kernel(x_ref, w_ref, b_ref, o_ref):
    k = pl.program_id(2)

    @pl.when(k == 0)
    def _():
        o_ref[...] = jnp.zeros_like(o_ref)

    # bf16 x bf16 -> f32 accumulate directly into the resident output block
    # (output index_map is constant along the K axis, so it stays in VMEM).
    o_ref[...] += jnp.dot(x_ref[...], w_ref[...],
                          preferred_element_type=jnp.float32)

    @pl.when(k == pl.num_programs(2) - 1)
    def _():
        o_ref[...] = jnp.maximum(o_ref[...] + b_ref[...], 0.0)


def fc_relu(x, w_p, b_p, *, n_out, tk, tn, tm_max=128):
    """out = relu(x @ w + b).

    x:   (R, K)  activations (any float dtype; cast to bf16 here)
    w_p: (Kp, Np) bf16, pre-padded / pre-permuted at init
    b_p: (1, Np)  f32,  pre-padded at init
    """
    R, K = x.shape
    Kp, Np = w_p.shape

    # Row padding: sublane multiple of 8, tile rows at <=128.
    Rp8 = max(8, ((R + 7) // 8) * 8)
    tm = min(tm_max, Rp8)
    Rp = ((Rp8 + tm - 1) // tm) * tm

    x_p = jnp.zeros((Rp, Kp), jnp.bfloat16).at[:R, :K].set(x.astype(jnp.bfloat16))

    grid = (Rp // tm, Np // tn, Kp // tk)

    out = pl.pallas_call(
        _fc_relu_kernel,
        out_shape=jax.ShapeDtypeStruct((Rp, Np), jnp.float32),
        grid_spec=pltpu.PrefetchScalarGridSpec(
            num_scalar_prefetch=0,
            grid=grid,
            in_specs=[
                pl.BlockSpec((tm, tk), lambda i, n, k: (i, k)),  # activations (bf16)
                pl.BlockSpec((tk, tn), lambda i, n, k: (k, n)),  # weight (bf16, pre-laid-out)
                pl.BlockSpec((1, tn), lambda i, n, k: (0, n)),   # bias (f32)
            ],
            out_specs=pl.BlockSpec((tm, tn), lambda i, n, k: (i, n)),
        ),
        compiler_params=pltpu.CompilerParams(
            dimension_semantics=("parallel", "parallel", "arbitrary")),
    )(x_p, w_p, b_p)
    return out[:R, :n_out]


# ----------------------------------------------------------------------------
# Pooler (ROIAlign) — data-dependent bilinear gather, kept in plain JAX glue,
# but in NHWC so every tap is a contiguous C-length (lane-friendly) load.
# TODO(synk): per-ROI data-dependent gathers have no clean rectangular BlockSpec
# equivalent; a dedicated Pallas gather/matmul pooler is a further optimization.
# TODO(synk): torch ROIAlign zeroes contributions from samples < -1 or > H/W;
# here coordinates are clipped, so boxes extending past the image edge can
# differ slightly from PyTorch.
# ----------------------------------------------------------------------------
def roi_align_nhwc(feat, boxes, batch_idx, resolution, spatial_scale, sampling_ratio):
    """feat: (B, H, W, C) NHWC; boxes: (R, 4) xyxy in image coords; -> (R, P, P, C)."""
    _, H, W, _ = feat.shape
    P = resolution
    sr = sampling_ratio

    x1 = boxes[:, 0] * spatial_scale
    y1 = boxes[:, 1] * spatial_scale
    x2 = boxes[:, 2] * spatial_scale
    y2 = boxes[:, 3] * spatial_scale
    roi_w = jnp.maximum(x2 - x1, 1.0)
    roi_h = jnp.maximum(y2 - y1, 1.0)
    bin_w = roi_w / P
    bin_h = roi_h / P

    pidx = jnp.arange(P, dtype=jnp.float32)
    sidx = (jnp.arange(sr, dtype=jnp.float32) + 0.5) / sr
    # (R, P, sr) sample coordinates along each axis
    ys = y1[:, None, None] + bin_h[:, None, None] * (pidx[None, :, None] + sidx[None, None, :])
    xs = x1[:, None, None] + bin_w[:, None, None] * (pidx[None, :, None] + sidx[None, None, :])

    def one_roi(bi, ys_r, xs_r):
        fmap = feat[bi]                                    # (H, W, C)
        y = jnp.clip(ys_r, 0.0, H - 1.0)
        x = jnp.clip(xs_r, 0.0, W - 1.0)
        y0 = jnp.floor(y).astype(jnp.int32)
        x0 = jnp.floor(x).astype(jnp.int32)
        y1i = jnp.minimum(y0 + 1, H - 1)
        x1i = jnp.minimum(x0 + 1, W - 1)
        ly = y - y0.astype(jnp.float32)
        lx = x - x0.astype(jnp.float32)
        hy = 1.0 - ly
        hx = 1.0 - lx

        def gv(yi, xi):
            # (P, sr, P, sr, C) — channel-contiguous taps
            return fmap[yi[:, :, None, None], xi[None, None, :, :], :]

        wy0 = hy[:, :, None, None, None]
        wy1 = ly[:, :, None, None, None]
        wx0 = hx[None, None, :, :, None]
        wx1 = lx[None, None, :, :, None]
        vals = (gv(y0, x0) * wy0 * wx0 + gv(y0, x1i) * wy0 * wx1 +
                gv(y1i, x0) * wy1 * wx0 + gv(y1i, x1i) * wy1 * wx1)
        return vals.mean(axis=(1, 3))                      # (P, P, C)

    return jax.vmap(one_roi)(batch_idx, ys, xs)


# ----------------------------------------------------------------------------
# Module wrapper (FC_TO_CONV=False branch)
# ----------------------------------------------------------------------------
class VGG16FC67ROIFeatureExtractorPallas:
    """Pooler -> flatten -> [Linear -> ReLU -> Dropout(eval=identity)]."""

    def __init__(self, in_channels, resolution, scale, sampling_ratio,
                 out_channels, key, tk=512, tn=512):
        self.resolution = resolution
        self.scale = scale
        self.sampling_ratio = sampling_ratio
        self.out_channels = out_channels

        k_in = in_channels * resolution * resolution

        # nn.init.normal_(weight, 0, 0.01); bias = 0.
        # Generated in torch's (C, P, P)-ordered row layout, then permuted ONCE
        # to (P, P, C) order to match the NHWC pooled flatten.
        w_cpp = 0.01 * jax.random.normal(key, (k_in, out_channels), jnp.float32)
        w_ppc = w_cpp.reshape(in_channels, resolution, resolution, out_channels)
        w_ppc = jnp.transpose(w_ppc, (1, 2, 0, 3)).reshape(k_in, out_channels)

        # Pad K and N to tile multiples and cast to bf16 ONCE (weight-streaming
        # FC is HBM-bandwidth bound; bf16 halves the traffic).
        self.tk = tk
        self.tn = tn if out_channels >= tn else ((out_channels + 127) // 128) * 128
        Kp = ((k_in + tk - 1) // tk) * tk
        Np = ((out_channels + self.tn - 1) // self.tn) * self.tn
        self.w_p = (jnp.zeros((Kp, Np), jnp.float32)
                    .at[:k_in, :out_channels].set(w_ppc)).astype(jnp.bfloat16)
        self.b_p = jnp.zeros((1, Np), jnp.float32)

    def __call__(self, x, boxes, batch_idx):
        # x is NCHW (PyTorch layout); transpose once to NHWC for fast gathers.
        feat = jnp.transpose(x, (0, 2, 3, 1))                        # (B, H, W, C)
        pooled = roi_align_nhwc(feat, boxes, batch_idx, self.resolution,
                                self.scale, self.sampling_ratio)     # (R, P, P, C)
        flat = pooled.reshape(pooled.shape[0], -1)                   # (R, P*P*C)
        # Dropout at inference is identity.
        return fc_relu(flat, self.w_p, self.b_p,
                       n_out=self.out_channels, tk=self.tk, tn=self.tn)


if __name__ == "__main__":
    key = jax.random.PRNGKey(0)
    k_feat, k_w, k_box = jax.random.split(key, 3)

    # SMALL stand-in shapes consistent with the module's forward:
    # real module uses in_channels=512, resolution=7, out_channels=4096.
    B, C, H, W = 2, 64, 16, 16
    R = 6
    resolution, scale, sampling_ratio = 7, 1.0 / 16.0, 2
    out_channels = 256

    feats = jax.random.normal(k_feat, (B, C, H, W), jnp.float32)

    kb1, kb2, kb3 = jax.random.split(k_box, 3)
    xy1 = jax.random.uniform(kb1, (R, 2), minval=0.0, maxval=128.0)
    wh = jax.random.uniform(kb2, (R, 2), minval=32.0, maxval=120.0)
    boxes = jnp.concatenate([xy1, xy1 + wh], axis=-1)            # (R, 4) xyxy, image coords
    batch_idx = jax.random.randint(kb3, (R,), 0, B)

    extractor = VGG16FC67ROIFeatureExtractorPallas(
        in_channels=C, resolution=resolution, scale=scale,
        sampling_ratio=sampling_ratio, out_channels=out_channels, key=k_w)

    out = extractor(feats, boxes, batch_idx)
    out = jax.block_until_ready(out)
    assert out.shape == (R, out_channels), out.shape
    assert bool(jnp.all(out >= 0.0))  # ReLU applied
    assert bool(jnp.isfinite(out).all())
    print("KERNEL_OK")
</pallas_src>

<mosaic_0001>
module attributes {stable_mosaic.version = 11 : i64} {
  func.func @_fc_relu_kernel(%arg0: i32, %arg1: i32, %arg2: i32, %arg3: memref<8x512xbf16, #tpu.memory_space<vmem>>, %arg4: memref<512x256xbf16, #tpu.memory_space<vmem>>, %arg5: memref<1x256xf32, #tpu.memory_space<vmem>>, %arg6: memref<8x256xf32, #tpu.memory_space<vmem>>) attributes {dimension_semantics = [#tpu.dimension_semantics<parallel>, #tpu.dimension_semantics<parallel>, #tpu.dimension_semantics<arbitrary>], iteration_bounds = array<i64: 1, 1, 7>, scalar_prefetch = 0 : i64, scratch_operands = 0 : i64, tpu.core_type = #tpu.core_type<tc>, window_params = [{transform_indices = @transform_0, window_bounds = array<i64: 8, 512>}, {transform_indices = @transform_1, window_bounds = array<i64: 512, 256>}, {transform_indices = @transform_2, window_bounds = array<i64: 1, 256>}, {transform_indices = @transform_3, window_bounds = array<i64: 8, 256>}]} {
    %c0_i32 = arith.constant 0 : i32
    %0 = arith.cmpi eq, %arg2, %c0_i32 : i32
    %1 = arith.extui %0 : i1 to i32
    %c0_i32_0 = arith.constant 0 : i32
    %2 = arith.cmpi ne, %1, %c0_i32_0 : i32
    scf.if %2 {
      %cst_9 = arith.constant 0.000000e+00 : f32
      %12 = vector.broadcast %cst_9 : f32 to vector<8x256xf32>
      %c0_10 = arith.constant 0 : index
      %c0_11 = arith.constant 0 : index
      %13 = vector.load %arg6[%c0_10, %c0_11] : memref<8x256xf32, #tpu.memory_space<vmem>>, vector<8x256xf32>
      tpu.vector_store %arg6[%c0_10, %c0_11], %12 {strides = array<i32>} : memref<8x256xf32, #tpu.memory_space<vmem>>, vector<8x256xf32>,
    } else {
    }
    %c0 = arith.constant 0 : index
    %c0_1 = arith.constant 0 : index
    %3 = vector.load %arg6[%c0, %c0_1] : memref<8x256xf32, #tpu.memory_space<vmem>>, vector<8x256xf32>
    %c0_2 = arith.constant 0 : index
    %c0_3 = arith.constant 0 : index
    %4 = vector.load %arg3[%c0_2, %c0_3] : memref<8x512xbf16, #tpu.memory_space<vmem>>, vector<8x512xbf16>
    %c0_4 = arith.constant 0 : index
    %c0_5 = arith.constant 0 : index
    %5 = vector.load %arg4[%c0_4, %c0_5] : memref<512x256xbf16, #tpu.memory_space<vmem>>, vector<512x256xbf16>
    %cst = arith.constant dense<0.000000e+00> : vector<8x256xf32>
    %6 = tpu.matmul %4, %5, %cst {dimension_numbers = #tpu.dot_dimension_numbers<[1], [0], [0], [1], [0, 0, 1, 1], [], []>} : vector<8x512xbf16>, vector<512x256xbf16>, vector<8x256xf32> -> vector<8x256xf32>
    %7 = arith.addf %3, %6 : vector<8x256xf32>
    %c0_6 = arith.constant 0 : index
    %c0_7 = arith.constant 0 : index
    %8 = vector.load %arg6[%c0_6, %c0_7] : memref<8x256xf32, #tpu.memory_space<vmem>>, vector<8x256xf32>
    tpu.vector_store %arg6[%c0_6, %c0_7], %7 {strides = array<i32>} : memref<8x256xf32, #tpu.memory_space<vmem>>, vector<8x256xf32>,
    %c6_i32 = arith.constant 6 : i32
    %9 = arith.cmpi eq, %arg2, %c6_i32 : i32
    %10 = arith.extui %9 : i1 to i32
    %c0_i32_8 = arith.constant 0 : i32
    %11 = arith.cmpi ne, %10, %c0_i32_8 : i32
    scf.if %11 {
      %c0_9 = arith.constant 0 : index
      %c0_10 = arith.constant 0 : index
      %12 = vector.load %arg6[%c0_9, %c0_10] : memref<8x256xf32, #tpu.memory_space<vmem>>, vector<8x256xf32>
      %c0_11 = arith.constant 0 : index
      %c0_12 = arith.constant 0 : index
      %13 = vector.load %arg5[%c0_11, %c0_12] : memref<1x256xf32, #tpu.memory_space<vmem>>, vector<1x256xf32>
      %14 = vector.broadcast %13 : vector<1x256xf32> to vector<8x256xf32>
      %15 = arith.addf %12, %14 : vector<8x256xf32>
      %cst_13 = arith.constant 0.000000e+00 : f32
      %16 = vector.broadcast %cst_13 : f32 to vector<8x256xf32>
      %17 = arith.maximumf %15, %16 : vector<8x256xf32>
      %c0_14 = arith.constant 0 : index
      %c0_15 = arith.constant 0 : index
      %18 = vector.load %arg6[%c0_14, %c0_15] : memref<8x256xf32, #tpu.memory_space<vmem>>, vector<8x256xf32>
      tpu.vector_store %arg6[%c0_14, %c0_15], %17 {strides = array<i32>} : memref<8x256xf32, #tpu.memory_space<vmem>>, vector<8x256xf32>,
    } else {
    }
    return
  }
  func.func @transform_0(%arg0: i32, %arg1: i32, %arg2: i32) -> (i32, i32) {
    %c0_i32 = arith.constant 0 : i32
    return %arg0, %arg2 : i32, i32
  }
  func.func @transform_1(%arg0: i32, %arg1: i32, %arg2: i32) -> (i32, i32) {
    %c0_i32 = arith.constant 0 : i32
    return %arg2, %arg1 : i32, i32
  }
  func.func @transform_2(%arg0: i32, %arg1: i32, %arg2: i32) -> (i32, i32) {
    %c0_i32 = arith.constant 0 : i32
    %c0_i32_0 = arith.constant 0 : i32
    return %c0_i32, %arg1 : i32, i32
  }
  func.func @transform_3(%arg0: i32, %arg1: i32, %arg2: i32) -> (i32, i32) {
    %c0_i32 = arith.constant 0 : i32
    return %arg0, %arg1 : i32, i32
  }
}

</mosaic_0001>

<bundles_post_ra>
// kernel: tpu_custom_call.1
= control target key start
LH: loop header
LB: loop body
LE: loop exit
PB: predicated region body
PF: predicated region fallthrough
CT: control target
= control target key end

     0   :  { %8 = vsyncpa [#allocation3], 0  ;;  %s1700_s0 = inlined_call_operand.hbm [shape: bf16[8,3584], index: 0, kind: input, shape index: {}]   ;;  %s1701_s1 = inlined_call_operand.hbm [shape: bf16[3584,256], index: 1, kind: input, shape index: {}]   ;;  %s1702_s2 = inlined_call_operand.hbm [shape: f32[1,256], index: 2, kind: input, shape index: {}]   ;;  %s1703_s3 = inlined_call_operand.hbm [shape: f32[8,256], index: 3, kind: output, shape index: {}]  }
   0x1   :  { %10 = vsyncpa [#allocation3 + $0x1], 0 }
   0x2   :  { %11 = vsyncpa [#allocation6], 0 }
   0x3   :  { %13 = vsyncpa [#allocation6 + $0x1], 0 }
   0x4   :  { %14 = vsyncpa [#allocation4], 0  ;;  %s1390_s12 = smov 0   ;;  %s1392_s13 = smov 0  }
   0x5   :  { %s1394_s14 = smov 0   ;;  %s1396_s15 = smov 0  }
   0x6   :  { %s1398_s16 = smov 0   ;;  %s1400_s17 = smov 0  }
   0x7 LB: > { %s1419_s18 = sadd.s32 4294967295, %s1361_s17   ;;  %s48_s19 = sadd.s32 1, %s1349_s14  ;;  %s1361_s17 = sphi %s1400_s17, %s20_s17   ;;  %s1357_s16 = sphi %s1398_s16, %s1724_s16   ;;  %s1353_s15 = sphi %s1396_s15, %s1723_s15   ;;  %s1349_s14 = sphi %s1394_s14, %s1722_s14   ;;  %s1345_s13 = sphi %s1392_s13, %s1721_s13   ;;  %s1341_s12 = sphi %s1390_s12, %s1720_s12  }
   0x8   : > { %p55_p0 = scmp.ne.s32.totalorder %s1349_s14, %s1345_s13  ;;  %p61_p1 = scmp.ne.s32.totalorder %s1345_s13, %s1341_s12 }
   0x9   : > { %p1704_p2 = scmp.eq.s32.totalorder %s1419_s18, 0  ;;  %p913_p3 = scmp.ge.s32.totalorder %s1361_s17, 1 }
   0xa   : > { %p154_p4 = scmp.lt.s32.totalorder %s1361_s17, 8  ;;  %s1363_s22 = smov [#allocation7]  }
   0xb   : > { %p1430_p5 = por %p1704_p2, %p61_p1  ;;  %s170_s23 = sshll.u32 %s1363_s22, 4  ;;  %s171_s23 = int_to_ptr.vmem [resolvable:$true] %s170_s23 }
   0xc   : > { %p1434_p6 = pnand %p913_p3, %p154_p4  ;;  %p56_p8 = scmp.eq.s32.totalorder %s1361_s17, 0 }
   0xd   : > { %s1707_s20 = scalar_select %p1430_p5, 1, 0 }
   0xe   : > { %s1708_s21 = scalar_select %p1434_p6, 1, 0 }
   0xf   : > { %p1016_p7 = pneg %p1434_p6  ;;  %s32_s25 = sadd.s32 1, %s1357_s16 }
  0x10   : > { %p1448_p10 = scmp.ge.s32.totalorder %s32_s25, 7  ;;  %p1455_p11 = por %p56_p8, %p55_p0 }
  0x11   : > { %p1443_p9 = pnand %p1016_p7, %p1704_p2  ;;  %s1185_s30 = scalar_lea.hbm %s1702_s2, 32 }
  0x12   : > { %s1710_s26 = scalar_select %p1448_p10, 1, 0 }
  0x13   : > { %s1711_s27 = scalar_select %p1455_p11, 1, 0 }
  0x14   : > { %p1186_p13 = scmp.ne.s32.totalorder %s1702_s2, %s1185_s30  ;;  %p1187_p1 = pneg %p1443_p9 }
  0x15   : > { %p1192_p0 = scmp.lt.u32.totalorder %s1185_s30, %s1702_s2 }
  0x16   : > { %p1188_p3 = pnand %p1187_p1, %p1186_p13 }
  0x18   : > { %p1189_p4 = pneg %p1188_p3 }
  0x1a   : > { %p1194_p7 = pnand %p1192_p0, %p1189_p4 }
  0x1c   : > { %1197 = shalt.err (!%p1194_p7)
}
  0x1d   : > { %s1198_s8 = scalar_lea.vmem %s171_s23, 32  ;;  %p1206_p5 = scmp.lt.s32.totalorder %s171_s23, %s171_s23 }
  0x1e   : > { %p1199_p8 = scmp.ne.s32.totalorder %s171_s23, %s1198_s8  ;;  %p1207_p6 = scmp.lt.s32.totalorder %s1198_s8, %s1198_s8 }
  0x20   : > { %p1201_p2 = pnand %p1199_p8, %p1187_p1  ;;  %p1208_p11 = por %p1207_p6, %p1206_p5 }
  0x22   : > { %p1202_p12 = pneg %p1201_p2 }
  0x24   : > { %p1209_p10 = pnand %p1208_p11, %p1202_p12 }
  0x26   : > { %1212 = shalt.err (!%p1209_p10)
}
  0x27   : > { %1019 = dma.hbm_to_vmem [thread:$0]  (!%p1443_p9), %s1702_s2, 32, %s171_s23, [#allocation6]  }
  0x28   : > { %p1712_p2 = scmp.ne.s32.totalorder %s1710_s26, 0  ;;  %s1481_s11 = sand.u32 1, %s1349_s14  }
  0x29   : > { %s1001_s12 = sshll.u32 %s1357_s16, 8  ;;  %s916_s24 = sshll.u32 %s1481_s11, 4 }
  0x2a   : > { %s1726_s25 = smov (%p1712_p2, %s32_s25), 0  ;;  %s1490_s30 = scalar_lea.hbm %s1700_s0, %s1001_s12 }
  0x2b   : > { %s44_s22 = ssub.s32 %s1357_s16, %s1726_s25  ;;  %s185_s26 = scalar_lea.vmem [#allocation2], %s916_s24 }
  0x2c   : > { %p46_p5 = scmp.eq.s32.totalorder %s44_s22, 0  ;;  %s195_s4 = sshll.u32 %s185_s26, 4  ;;  %s1505_s4 = int_to_ptr.vmem [resolvable:$true] %s195_s4 }
  0x2d   : > { %p1713_p6 = scmp.ne.s32.totalorder %s1711_s27, 0  ;;  %p1714_p9 = scmp.lt.s32.totalorder %s1361_s17, 7 }
  0x2e   : > { %s1495_s23 = scalar_select %p46_p5, %s1349_s14, %s48_s19  }
  0x2f   : > { %p1501_p10 = pnand %p1714_p9, %p1713_p6  ;;  %s919_s6 = sshll.u32 %s1481_s11, 9 }
  0x30   : > { %s182_s7 = scalar_lea.sflag [#allocation3], %s1481_s11  ;;  %s1213_s8 = scalar_lea.hbm %s1490_s30, 256 }
  0x31   : > { %p1214_p11 = scmp.ne.s32.totalorder %s1490_s30, %s1213_s8  ;;  %p1215_p12 = pneg %p1501_p10 }
  0x32   : > { %s1218_s9 = scalar_lea.hbm %s1700_s0, 1792  ;;  %p1219_p3 = scmp.lt.u32.totalorder %s1490_s30, %s1700_s0 }
  0x33   : > { %p1216_p13 = pnand %p1215_p12, %p1214_p11  ;;  %p1220_p4 = scmp.lt.u32.totalorder %s1218_s9, %s1213_s8 }
  0x34   : > { %p1222_p7 = scmp.lt.u32.totalorder %s1213_s8, %s1490_s30 }
  0x35   : > { %p1217_p1 = pneg %p1216_p13  ;;  %p1221_p0 = por %p1220_p4, %p1219_p3 }
  0x37   : > { %p1223_p8 = por %p1222_p7, %p1221_p0 }
  0x39   : > { %p1224_p2 = pnand %p1223_p8, %p1217_p1 }
  0x3b   : > { %1227 = shalt.err (!%p1224_p2)
}
  0x3c   : > { %s1228_s22 = scalar_lea.vmem %s1505_s4, 256  ;;  %s1364_s24 = smov [#allocation2]  }
  0x3d   : > { %p1229_p5 = scmp.ne.s32.totalorder %s1505_s4, %s1228_s22  ;;  %s1233_s28 = sshll.u32 %s1364_s24, 4  ;;  %s1234_s28 = int_to_ptr.vmem [resolvable:$false] %s1233_s28 }
  0x3e   : > { %s1235_s29 = scalar_lea.vmem %s1234_s28, 512  ;;  %p1236_p11 = scmp.lt.s32.totalorder %s1505_s4, %s1234_s28 }
  0x3f   : > { %p1231_p6 = pnand %p1229_p5, %p1215_p12  ;;  %p1237_p13 = scmp.lt.s32.totalorder %s1235_s29, %s1228_s22 }
  0x41   : > { %p1232_p9 = pneg %p1231_p6  ;;  %p1238_p3 = por %p1237_p13, %p1236_p11 }
  0x43   : > { %p1239_p4 = pnand %p1238_p3, %p1232_p9 }
  0x45   : > { %1242 = shalt.err (!%p1239_p4)
}
  0x46   : > { %1023 = dma.hbm_to_vmem [thread:$0]  (!%p1501_p10), %s1490_s30, 256, %s1505_s4, %s182_s7  }
  0x47   : > { %s1003_s26 = sshll.u32 %s1357_s16, 13  ;;  %s206_s8 = scalar_lea.vmem [#allocation5], %s919_s6 }
  0x48   : > { %s216_s19 = sshll.u32 %s206_s8, 4  ;;  %s202_s27 = sand.u32 1, %s1361_s17   ;;  %s1537_s19 = int_to_ptr.vmem [resolvable:$true] %s216_s19 }
  0x49   : > { %s1543_s12 = scalar_lea.hbm %s1701_s1, %s1003_s26  ;;  %s1545_s22 = scalar_lea.sflag [#allocation6], %s202_s27 }
  0x4a   : > { %s1243_s24 = scalar_lea.hbm %s1543_s12, 8192  ;;  %s1248_s4 = scalar_lea.hbm %s1701_s1, 57344 }
  0x4b   : > { %p1244_p1 = scmp.ne.s32.totalorder %s1543_s12, %s1243_s24  ;;  %p1249_p8 = scmp.lt.u32.totalorder %s1543_s12, %s1701_s1 }
  0x4c   : > { %p1250_p2 = scmp.lt.u32.totalorder %s1248_s4, %s1243_s24  ;;  %p1252_p6 = scmp.lt.u32.totalorder %s1243_s24, %s1543_s12 }
  0x4d   : > { %p1246_p0 = pnand %p1244_p1, %p1215_p12 }
  0x4e   : > { %p1251_p5 = por %p1250_p2, %p1249_p8 }
  0x4f   : > { %p1247_p7 = pneg %p1246_p0 }
  0x50   : > { %p1253_p9 = por %p1252_p6, %p1251_p5 }
  0x52   : > { %p1254_p11 = pnand %p1253_p9, %p1247_p7 }
  0x54   : > { %1257 = shalt.err (!%p1254_p11)
}
  0x55   : > { %s1258_s28 = scalar_lea.vmem %s1537_s19, 8192  ;;  %s1365_s29 = smov [#allocation5]  }
  0x56   : > { %p1259_p13 = scmp.ne.s32.totalorder %s1537_s19, %s1258_s28  ;;  %s1263_s26 = sshll.u32 %s1365_s29, 4  ;;  %s1264_s26 = int_to_ptr.vmem [resolvable:$false] %s1263_s26 }
  0x57   : > { %s1265_s8 = scalar_lea.vmem %s1264_s26, 16384  ;;  %p1266_p1 = scmp.lt.s32.totalorder %s1537_s19, %s1264_s26 }
  0x58   : > { %p1261_p3 = pnand %p1259_p13, %p1215_p12  ;;  %p1267_p0 = scmp.lt.s32.totalorder %s1265_s8, %s1258_s28 }
  0x5a   : > { %p1262_p4 = pneg %p1261_p3  ;;  %p1268_p8 = por %p1267_p0, %p1266_p1 }
  0x5c   : > { %p1269_p2 = pnand %p1268_p8, %p1262_p4 }
  0x5e   : > { %1272 = shalt.err (!%p1269_p2)
}
  0x5f   : > { %s1366_s27 = smov 128   ;;  %s1367_s9 = smov 8  }
  0x60   : > { %1026 = dma.hbm_to_vmem [thread:$0]  (!%p1501_p10), %s1543_s12, 8192, %s1537_s19, %s1545_s22, %s1366_s27, %s1366_s27, %s1367_s9  }
  0x61   : > { %p1716_p12 = scmp.ne.s32.totalorder %s1708_s21, 0 }
  0x62   : > { %s230_s10 = sand.u32 (!%p1716_p12), 1, %s1345_s13   ;;  %p1717_p7 = scmp.ne.s32.totalorder (!%p1716_p12), %s1707_s20, 0 }
  0x63   : > { %228 = sbr.rel (%p1716_p12) target bundleno = 443 (0x1bb), region = 32  ;;  %s924_s24 = sshll.u32 (!%p1716_p12), %s230_s10, 4 }
  0x64   : > { %s231_s11 = scalar_lea.sflag (!%p1716_p12), [#allocation3], %s230_s10  ;;  %s1574_s30 = scalar_lea.vmem (!%p1716_p12), [#allocation2], %s924_s24 }
  0x6a   : > { %1324 = dma.done.wait (%p1717_p7), %s231_s11, 256  }
  0x6b   : > { %1326 = vsyncadd (%p1717_p7), %s231_s11, 4294967040  ;;  %s239_s4 = sand.u32 1, %s1419_s18   ;;  %s925_s5 = sshll.u32 %s230_s10, 9 }
  0x6c   : > { %s240_s19 = scalar_lea.sflag [#allocation6], %s239_s4  ;;  %s1581_s12 = scalar_lea.vmem [#allocation5], %s925_s5 }
  0x6d   : > { %1328 = dma.done.wait (%p1717_p7), %s240_s19, 8192  }
  0x6e   : > { %1330 = vsyncadd (%p1717_p7), %s240_s19, 4294959104  ;;  %p1718_p10 = scmp.eq.s32.totalorder %s1419_s18, 0 }
  0x70   : > { %1332 = dma.done.wait (%p1718_p10), [#allocation6], 32   ;;  %p1719_p5 = pmov %p1718_p10 }
  0x71   : > { %p927_p6 = scmp.ne.s32.totalorder %s1353_s15, 0 }
  0x72   : > { %1334 = vsyncadd (%p1719_p5), [#allocation6], 4294967264  ;;  %v1368_v0 = vmov (!%p927_p6), 0.0  }
  0x73   : > { %278 = sbr.rel (%p927_p6) target bundleno = 122 (0x7a), region = 48  ;;  %279 = vst [vmem:[#allocation8] sm:$0xff] (!%p927_p6), %v1368_v0  ;;  %280 = vst [vmem:[#allocation8 + $0x8] sm:$0xff] (!%p927_p6), %v1368_v0 }
  0x7a PF: > { %v1085_v1 = vld [vmem:[%s1581_s12 + $0x4] ss:$8 sps:$4 sm:$0xff]   ;;  %v1089_v3 = vld [vmem:[%s1581_s12] ss:$8 sps:$4 sm:$0xff]   ;;  %v1091_v5 = vld [vmem:[%s1581_s12 + $0x14] ss:$8 sps:$4 sm:$0xff]  }
  0x7b   : > { %v1087_v2 = vld [vmem:[%s1581_s12 + $0x104] ss:$8 sps:$4 sm:$0xff]   ;;  %683 = vmatprep.subr.bf16.mxu0 %v1085_v1  ;;  %v1090_v4 = vld [vmem:[%s1581_s12 + $0x100] ss:$8 sps:$4 sm:$0xff]   ;;  %v1093_v6 = vld [vmem:[%s1581_s12 + $0x114] ss:$8 sps:$4 sm:$0xff]  }
  0x7c   : > { %724 = vmatprep.subr.bf16.mxu1 %v1087_v2  ;;  %684 = vmatpush1.bf16.msra.mxu0 %v1089_v3  ;;  %v1095_v7 = vld [vmem:[%s1581_s12 + $0x10] ss:$8 sps:$4 sm:$0xff]   ;;  %v1097_v9 = vld [vmem:[%s1581_s12 + $0x24] ss:$8 sps:$4 sm:$0xff]   ;;  %v1101_v11 = vld [vmem:[%s1581_s12 + $0x20] ss:$8 sps:$4 sm:$0xff]  }
  0x7d   : > { %725 = vmatpush1.bf16.msra.mxu1 %v1090_v4  ;;  %685 = vmatprep.subr.bf16.mxu0 %v1091_v5  ;;  %v1096_v8 = vld [vmem:[%s1581_s12 + $0x110] ss:$8 sps:$4 sm:$0xff]   ;;  %v1099_v10 = vld [vmem:[%s1581_s12 + $0x124] ss:$8 sps:$4 sm:$0xff]   ;;  %v1102_v12 = vld [vmem:[%s1581_s12 + $0x120] ss:$8 sps:$4 sm:$0xff]  }
  0x7e   : > { %726 = vmatprep.subr.bf16.mxu1 %v1093_v6  ;;  %v1103_v13 = vld [vmem:[%s1581_s12 + $0x34] ss:$8 sps:$4 sm:$0xff]   ;;  %v1107_v15 = vld [vmem:[%s1581_s12 + $0x30] ss:$8 sps:$4 sm:$0xff]   ;;  %v1109_v17 = vld [vmem:[%s1581_s12 + $0x44] ss:$8 sps:$4 sm:$0xff]  }
  0x7f   : > { %v1105_v14 = vld [vmem:[%s1581_s12 + $0x134] ss:$8 sps:$4 sm:$0xff]   ;;  %v1108_v16 = vld [vmem:[%s1581_s12 + $0x130] ss:$8 sps:$4 sm:$0xff]   ;;  %v1111_v18 = vld [vmem:[%s1581_s12 + $0x144] ss:$8 sps:$4 sm:$0xff]  }
  0x80   : > { %686 = vmatpush1.bf16.msra.mxu0 %v1095_v7  ;;  %v1113_v19 = vld [vmem:[%s1581_s12 + $0x40] ss:$8 sps:$4 sm:$0xff]   ;;  %v1115_v21 = vld [vmem:[%s1581_s12 + $0x54] ss:$8 sps:$4 sm:$0xff]   ;;  %v1119_v23 = vld [vmem:[%s1581_s12 + $0x50] ss:$8 sps:$4 sm:$0xff]  }
  0x81   : > { %727 = vmatpush1.bf16.msra.mxu1 %v1096_v8  ;;  %687 = vmatprep.subr.bf16.mxu0 %v1097_v9  ;;  %v1114_v20 = vld [vmem:[%s1581_s12 + $0x140] ss:$8 sps:$4 sm:$0xff]   ;;  %v1117_v22 = vld [vmem:[%s1581_s12 + $0x154] ss:$8 sps:$4 sm:$0xff]   ;;  %v1120_v24 = vld [vmem:[%s1581_s12 + $0x150] ss:$8 sps:$4 sm:$0xff]  }
  0x82   : > { %728 = vmatprep.subr.bf16.mxu1 %v1099_v10  ;;  %v1121_v25 = vld [vmem:[%s1581_s12 + $0x64] ss:$8 sps:$4 sm:$0xff]   ;;  %v1125_v27 = vld [vmem:[%s1581_s12 + $0x60] ss:$8 sps:$4 sm:$0xff]   ;;  %v1127_v29 = vld [vmem:[%s1581_s12 + $0x74] ss:$8 sps:$4 sm:$0xff]  }
  0x83   : > { %v1123_v26 = vld [vmem:[%s1581_s12 + $0x164] ss:$8 sps:$4 sm:$0xff]   ;;  %v1126_v28 = vld [vmem:[%s1581_s12 + $0x160] ss:$8 sps:$4 sm:$0xff]   ;;  %v1129_v30 = vld [vmem:[%s1581_s12 + $0x174] ss:$8 sps:$4 sm:$0xff]  }
  0x84   : > { %688 = vmatpush1.bf16.msra.mxu0 %v1101_v11  ;;  %v1131_v31 = vld [vmem:[%s1581_s12 + $0x70] ss:$8 sps:$4 sm:$0xff]   ;;  %v1133_v33 = vld [vmem:[%s1581_s12 + $0x84] ss:$8 sps:$4 sm:$0xff]   ;;  %v1137_v35 = vld [vmem:[%s1581_s12 + $0x80] ss:$8 sps:$4 sm:$0xff]  }
  0x85   : > { %729 = vmatpush1.bf16.msra.mxu1 %v1102_v12  ;;  %689 = vmatprep.subr.bf16.mxu0 %v1103_v13  ;;  %v1132_v32 = vld [vmem:[%s1581_s12 + $0x170] ss:$8 sps:$4 sm:$0xff]   ;;  %v1135_v34 = vld [vmem:[%s1581_s12 + $0x184] ss:$8 sps:$4 sm:$0xff]   ;;  %v1138_v36 = vld [vmem:[%s1581_s12 + $0x180] ss:$8 sps:$4 sm:$0xff]  }
  0x86   : > { %730 = vmatprep.subr.bf16.mxu1 %v1105_v14  ;;  %v1139_v37 = vld [vmem:[%s1581_s12 + $0x94] ss:$8 sps:$4 sm:$0xff]   ;;  %v1143_v39 = vld [vmem:[%s1581_s12 + $0x90] ss:$8 sps:$4 sm:$0xff]   ;;  %v1145_v41 = vld [vmem:[%s1581_s12 + $0xa4] ss:$8 sps:$4 sm:$0xff]  }
  0x87   : > { %v1141_v38 = vld [vmem:[%s1581_s12 + $0x194] ss:$8 sps:$4 sm:$0xff]   ;;  %v1144_v40 = vld [vmem:[%s1581_s12 + $0x190] ss:$8 sps:$4 sm:$0xff]   ;;  %v1147_v42 = vld [vmem:[%s1581_s12 + $0x1a4] ss:$8 sps:$4 sm:$0xff]  }
  0x88   : > { %690 = vmatpush1.bf16.msra.mxu0 %v1107_v15  ;;  %v1149_v43 = vld [vmem:[%s1581_s12 + $0xa0] ss:$8 sps:$4 sm:$0xff]   ;;  %v1151_v45 = vld [vmem:[%s1581_s12 + $0xb4] ss:$8 sps:$4 sm:$0xff]   ;;  %v1155_v50 = vld [vmem:[%s1581_s12 + $0xb0] ss:$8 sps:$4 sm:$0xff]  }
  0x89   : > { %731 = vmatpush1.bf16.msra.mxu1 %v1108_v16  ;;  %691 = vmatprep.subr.bf16.mxu0 %v1109_v17  ;;  %v1150_v44 = vld [vmem:[%s1581_s12 + $0x1a0] ss:$8 sps:$4 sm:$0xff]   ;;  %v1153_v46 = vld [vmem:[%s1581_s12 + $0x1b4] ss:$8 sps:$4 sm:$0xff]   ;;  %v1156_v51 = vld [vmem:[%s1581_s12 + $0x1b0] ss:$8 sps:$4 sm:$0xff]  }
  0x8a   : > { %732 = vmatprep.subr.bf16.mxu1 %v1111_v18  ;;  %v283_v47 = vld [vmem:[%s1574_s30] sm:$0xff]  ;;  %v284_v49 = vld [vmem:[%s1574_s30 + $0x8] sm:$0xff]  ;;  %p996_p9 = scmp.ne.s32.totalorder %s1353_s15, 6 }
  0x8b   : > { %v929_v48 = vcombine.high %v283_v47, %v283_v47  ;;  %v931_v52 = vcombine.high %v284_v49, %v284_v49  ;;  %v1157_v53 = vld [vmem:[%s1581_s12 + $0xc4] ss:$8 sps:$4 sm:$0xff]   ;;  %v1161_v55 = vld [vmem:[%s1581_s12 + $0xc0] ss:$8 sps:$4 sm:$0xff]   ;;  %v1163_v57 = vld [vmem:[%s1581_s12 + $0xd4] ss:$8 sps:$4 sm:$0xff]   ;;  %v928_v5 = vcombine.low %v283_v47, %v283_v47  ;;  %v930_v6 = vcombine.low %v284_v49, %v284_v49 }
  0x8c   : > { %692 = vmatpush1.bf16.msra.mxu0 %v1113_v19  ;;  %v1159_v54 = vld [vmem:[%s1581_s12 + $0x1c4] ss:$8 sps:$4 sm:$0xff]   ;;  %v1162_v56 = vld [vmem:[%s1581_s12 + $0x1c0] ss:$8 sps:$4 sm:$0xff]   ;;  %v1165_v58 = vld [vmem:[%s1581_s12 + $0x1d4] ss:$8 sps:$4 sm:$0xff]  }
  0x8d   : > { %733 = vmatpush1.bf16.msra.mxu1 %v1114_v20  ;;  %693 = vmatprep.subr.bf16.mxu0 %v1115_v21  ;;  %v1167_v59 = vld [vmem:[%s1581_s12 + $0xd0] ss:$8 sps:$4 sm:$0xff]   ;;  %v1169_v61 = vld [vmem:[%s1581_s12 + $0xe4] ss:$8 sps:$4 sm:$0xff]   ;;  %v1173_v63 = vld [vmem:[%s1581_s12 + $0xe0] ss:$8 sps:$4 sm:$0xff]   ;;  %v777_v21 = vlaneseq (!%p996_p9) }
  0x8e   : > { %734 = vmatprep.subr.bf16.mxu1 %v1117_v22  ;;  %715 = vmatprep.mubr.bf16.mxu0 %v929_v48  ;;  %v1168_v60 = vld [vmem:[%s1581_s12 + $0x1d0] ss:$8 sps:$4 sm:$0xff]   ;;  %v1171_v62 = vld [vmem:[%s1581_s12 + $0x1e4] ss:$8 sps:$4 sm:$0xff]   ;;  %v1174_v0 = vld [vmem:[%s1581_s12 + $0x1e0] ss:$8 sps:$4 sm:$0xff]  }
  0x8f   : > { %756 = vmatprep.mubr.bf16.mxu1 %v931_v52  ;;  %v1175_v1 = vld [vmem:[%s1581_s12 + $0xf4] ss:$8 sps:$4 sm:$0xff]   ;;  %v1179_v3 = vld [vmem:[%s1581_s12 + $0xf0] ss:$8 sps:$4 sm:$0xff]   ;;  %v281_v8 = vld [vmem:[#allocation8] sm:$0xff]  ;;  %v778_v22 = vshrl.u32 (!%p996_p9), %v777_v21, 7 }
  0x90   : > { %694 = vmatpush1.bf16.msra.mxu0 %v1119_v23  ;;  %v1177_v2 = vld [vmem:[%s1581_s12 + $0x1f4] ss:$8 sps:$4 sm:$0xff]   ;;  %v1180_v4 = vld [vmem:[%s1581_s12 + $0x1f0] ss:$8 sps:$4 sm:$0xff]   ;;  %v775_v23 = vld [vmem:[#allocation7] sm:$0x3] (!%p996_p9) }
  0x91   : > { %735 = vmatpush1.bf16.msra.mxu1 %v1120_v24  ;;  %695 = vmatprep.subr.bf16.mxu0 %v1121_v25  ;;  %v282_v12 = vld [vmem:[#allocation8 + $0x8] sm:$0xff]  ;;  %v779_v24 = vsub.s32 (!%p996_p9), 0, %v778_v22  ;;  %v783_v25 = vsub.s32 (!%p996_p9), 1, %v778_v22 }
  0x92   : > { %736 = vmatprep.subr.bf16.mxu1 %v1123_v26 }
  0x94   : > { %696 = vmatpush1.bf16.msra.mxu0 %v1125_v27 }
  0x95   : > { %737 = vmatpush1.bf16.msra.mxu1 %v1126_v28  ;;  %697 = vmatprep.subr.bf16.mxu0 %v1127_v29  ;;  %v780_v28 = vrot.slane (!%p996_p9), %v775_v23, %v779_v24  ;;  %v784_v29 = vrot.slane (!%p996_p9), %v775_v23, %v783_v25 }
  0x96   : > { %738 = vmatprep.subr.bf16.mxu1 %v1129_v30 }
  0x98   : > { %698 = vmatpush1.bf16.msra.mxu0 %v1131_v31 }
  0x99   : > { %739 = vmatpush1.bf16.msra.mxu1 %v1132_v32  ;;  %699 = vmatprep.subr.bf16.mxu0 %v1133_v33 }
  0x9a   : > { %740 = vmatprep.subr.bf16.mxu1 %v1135_v34 }
  0x9c   : > { %700 = vmatpush1.bf16.msra.mxu0 %v1137_v35 }
  0x9d   : > { %741 = vmatpush1.bf16.msra.mxu1 %v1138_v36  ;;  %701 = vmatprep.subr.bf16.mxu0 %v1139_v37 }
  0x9e   : > { %742 = vmatprep.subr.bf16.mxu1 %v1141_v38 }
  0xa0   : > { %702 = vmatpush1.bf16.msra.mxu0 %v1143_v39 }
  0xa1   : > { %743 = vmatpush1.bf16.msra.mxu1 %v1144_v40  ;;  %703 = vmatprep.subr.bf16.mxu0 %v1145_v41 }
  0xa2   : > { %744 = vmatprep.subr.bf16.mxu1 %v1147_v42 }
  0xa4   : > { %704 = vmatpush1.bf16.msra.mxu0 %v1149_v43 }
  0xa5   : > { %745 = vmatpush1.bf16.msra.mxu1 %v1150_v44  ;;  %705 = vmatprep.subr.bf16.mxu0 %v1151_v45 }
  0xa6   : > { %746 = vmatprep.subr.bf16.mxu1 %v1153_v46 }
  0xa8   : > { %706 = vmatpush1.bf16.msra.mxu0 %v1155_v50 }
  0xa9   : > { %747 = vmatpush1.bf16.msra.mxu1 %v1156_v51  ;;  %707 = vmatprep.subr.bf16.mxu0 %v1157_v53 }
  0xaa   : > { %748 = vmatprep.subr.bf16.mxu1 %v1159_v54 }
  0xac   : > { %708 = vmatpush1.bf16.msra.mxu0 %v1161_v55 }
  0xad   : > { %749 = vmatpush1.bf16.msra.mxu1 %v1162_v56  ;;  %709 = vmatprep.subr.bf16.mxu0 %v1163_v57 }
  0xae   : > { %750 = vmatprep.subr.bf16.mxu1 %v1165_v58 }
  0xb0   : > { %710 = vmatpush1.bf16.msra.mxu0 %v1167_v59 }
  0xb1   : > { %751 = vmatpush1.bf16.msra.mxu1 %v1168_v60  ;;  %711 = vmatprep.subr.bf16.mxu0 %v1169_v61 }
  0xb2   : > { %752 = vmatprep.subr.bf16.mxu1 %v1171_v62 }
  0xb4   : > { %712 = vmatpush1.bf16.msra.mxu0 %v1173_v63 }
  0xb5   : > { %753 = vmatpush1.bf16.msra.mxu1 %v1174_v0  ;;  %713 = vmatprep.subr.bf16.mxu0 %v1175_v1 }
  0xb6   : > { %754 = vmatprep.subr.bf16.mxu1 %v1177_v2 }
  0xb8   : > { %714 = vmatpush1.bf16.msra.mxu0 %v1179_v3 }
  0xb9   : > { %755 = vmatpush1.bf16.msra.mxu1 %v1180_v4 }
  0xbb   : > { %716 = vmatmul.mubr.bf16.vlgmr.msra.gmra.mrb[0].mxu0 %v928_v5 }
  0xbc   : > { %757 = vmatmul.mubr.bf16.vlgmr.msra.gmra.mrb[0].mxu1 %v930_v6 }
 0x18e   : > { %v717_v7 = vpop.f32.mrb[0].mxu0 }
 0x18f   : > { %v758_v9 = vpop.f32.mrb[0].mxu1  ;;  %v719_v11 = vpop.f32.mrb[1].mxu0  ;;  %772 = sbr.rel (%p996_p9) target bundleno = 418 (0x1a2), region = 52 }
 0x190   : > { %v759_v10 = vadd.f32 %v758_v9, %v717_v7  ;;  %v760_v13 = vpop.f32.mrb[1].mxu1  ;;  %v721_v15 = vpop.f32.mrb[2].mxu0 }
 0x191   : > { %v761_v14 = vadd.f32 %v760_v13, %v719_v11  ;;  %v762_v16 = vpop.f32.mrb[2].mxu1  ;;  %v722_v18 = vpop.f32.mrb[3].mxu0 }
 0x192   : > { %v765_v17 = vadd.f32 %v759_v10, %v281_v8  ;;  %v763_v19 = vpop.f32.mrb[3].mxu1 }
 0x193   : > { %v766_v20 = vadd.f32 %v761_v14, %v282_v12 }
 0x194   : > { %767 = vst [vmem:[#allocation8] sm:$0xff] %v765_v17 }
 0x195   : > { %768 = vst [vmem:[#allocation8 + $0x8] sm:$0xff] %v766_v20 }
 0x19b   : > { %v773_v26 = vld [vmem:[#allocation8] sm:$0xff] }
 0x19c   : > { %v774_v27 = vld [vmem:[#allocation8 + $0x8] sm:$0xff]  ;;  %v787_v30 = vadd.f32 %v780_v28, %v773_v26 }
 0x19d   : > { %v788_v31 = vadd.f32 %v784_v29, %v774_v27 }
 0x19e   : > { %v789_v32 = vmax.f32 %v787_v30, 0.0 }
 0x19f   : > { %v790_v33 = vmax.f32 %v788_v31, 0.0 }
 0x1a0   : > { %791 = vst [vmem:[#allocation8] sm:$0xff] %v789_v32 }
 0x1a1   : > { %792 = vst [vmem:[#allocation8 + $0x8] sm:$0xff] %v790_v33 }
 0x1a2 PF: > { %p1030_p11 = scmp.eq.s32.totalorder %s1419_s18, 6  ;;  %s1369_s15 = smov [#allocation8]  }
 0x1a3   : > { %s805_s20 = sshll.u32 %s1369_s15, 4  ;;  %s806_s20 = int_to_ptr.vmem [resolvable:$true] %s805_s20 }
 0x1a4   : > { %s1273_s21 = scalar_lea.vmem %s806_s20, 256  ;;  %p1280_p1 = scmp.lt.s32.totalorder %s806_s20, %s806_s20 }
 0x1a5   : > { %p1274_p13 = scmp.ne.s32.totalorder %s806_s20, %s1273_s21  ;;  %p1281_p0 = scmp.lt.s32.totalorder %s1273_s21, %s1273_s21 }
 0x1a7   : > { %p1275_p3 = pnand %p1274_p13, %p1030_p11  ;;  %p1282_p8 = por %p1281_p0, %p1280_p1 }
 0x1a9   : > { %p1276_p4 = pneg %p1275_p3 }
 0x1ab   : > { %p1283_p2 = pnand %p1282_p8, %p1276_p4 }
 0x1ad   : > { %1286 = shalt.err (!%p1283_p2)
}
 0x1ae   : > { %s1287_s7 = scalar_lea.hbm %s1703_s3, 256 }
 0x1af   : > { %p1288_p12 = scmp.ne.s32.totalorder %s1703_s3, %s1287_s7  ;;  %p1293_p5 = scmp.lt.u32.totalorder %s1287_s7, %s1703_s3 }
 0x1b1   : > { %p1289_p7 = pnand %p1288_p12, %p1030_p11 }
 0x1b3   : > { %p1290_p10 = pneg %p1289_p7 }
 0x1b5   : > { %p1295_p6 = pnand %p1293_p5, %p1290_p10 }
 0x1b7   : > { %1298 = shalt.err (!%p1295_p6)
}
 0x1b8   : > { %1013 = dma.vmem_to_hbm [thread:$0]  (%p1030_p11), %s806_s20, 256, %s1703_s3, [#allocation4]  }
 0x1b9   : > { %1336 = dma.done.wait (%p1030_p11), [#allocation4], 256  }
 0x1ba   : > { %1338 = vsyncadd (%p1030_p11), [#allocation4], 4294967040 }
 0x1bb PF: > { %s20_s17 = sadd.s32 1, %s1361_s17   ;;  %s1720_s12 = smov %s1345_s13 }
 0x1bc   : > { %p17_p9 = scmp.ge.s32.totalorder %s20_s17, 9   ;;  %s1721_s13 = smov %s1349_s14 }
 0x1bd   : > { %s1722_s14 = smov %s1495_s23  ;;  %s1723_s15 = smov %s1357_s16 }
 0x1be   : > { %s1724_s16 = smov %s1726_s25  ;;  %19 = sbr.rel (!%p17_p9) target bundleno = 7 (0x7), region = 96 }
 0x1c5   :  { %818 = vsyncpa [#allocation3], 1 }
 0x1c6   :  { %820 = vsyncpa [#allocation3 + $0x1], 1 }
 0x1c7   :  { %821 = vsyncpa [#allocation6], 1 }
 0x1c8   :  { %823 = vsyncpa [#allocation6 + $0x1], 1 }
 0x1c9   :  { %824 = vsyncpa [#allocation4], 1 }
 0x1ca   :  { %826 = vsyncpa [#allocation4 + $0x1], 1 }

</bundles_post_ra>
